<compile_context>
chip_gen: v7x
topology: tpu7x:2x2x1
jax: 0.10.0
libtpu: 0.0.40
codegen_flags: <defaults>
</compile_context>

<pallas_src>
import functools

import jax
import jax.numpy as jnp
from jax.experimental import pallas as pl
from jax.experimental.pallas import tpu as pltpu


def _proj_kernel(x_ref, w_ref, b_ref, o_ref):
    # x_ref: (TM, cpp_p) bf16   w_ref: (cpp_p, ne_p) bf16
    # b_ref: (1, ne_p)   f32    o_ref: (TM, ne_p)    out dtype
    acc = jnp.dot(x_ref[...], w_ref[...], preferred_element_type=jnp.float32)
    o_ref[...] = (acc + b_ref[...]).astype(o_ref.dtype)


def _round_up(a, m):
    return (a + m - 1) // m * m


def _vmem_budget_bytes():
    """Half of physical VMEM (headroom for compiler scratch); conservative
    fallback = v7x's 64 MiB physical if the query is unavailable."""
    try:
        cap = pltpu.get_tpu_info().vmem_capacity_bytes
    except Exception:
        cap = None
    if not cap:
        cap = 64 * 1024 * 1024
    return int(cap) // 2


def _pick_tm(m, cpp_p, ne_p, out_bytes, tm_max):
    """Largest M tile whose double-buffered footprint fits the VMEM budget."""
    budget = _vmem_budget_bytes()
    # weight + bias stay resident (conservatively counted double-buffered)
    resident = 2 * (cpp_p * ne_p * 2) + 2 * (8 * ne_p * 4)
    avail = budget - resident - (2 << 20)           # 2 MiB slack for scratch
    per_row = 2 * (cpp_p * 2) + 2 * (ne_p * out_bytes)   # 2x buffered in + out
    tm = max(avail // per_row, 16) if avail > 0 else 16
    tm = int(min(tm, tm_max, _round_up(m, 16)))
    tm = (tm // 256) * 256 if tm >= 256 else max((tm // 16) * 16, 16)
    return tm, budget


def patch_embedding(x, weight, bias, *, patch_size, out_dtype=jnp.bfloat16,
                    tm_max=2048, use_input_fusion=True):
    """
    x:      (B, C, H, W)
    weight: (n_embd, cpp)  (PyTorch nn.Linear layout), cpp = C*p*p
    bias:   (n_embd,)
    returns (B, N, n_embd), N = (H//p)*(W//p)

    out_dtype defaults to bfloat16 (halves output HBM writeback; accumulation
    is still f32 in-kernel).  Pass out_dtype=jnp.float32 for an f32 output.
    """
    p = patch_size
    B, C, H, W = x.shape
    n_embd, cpp = weight.shape
    assert cpp == C * p * p

    # ---- glue: patchify exactly like unfold/unfold/permute/view ----
    # (B,C,H,W) -> (B,C,H/p,p,W/p,p) -> (B,H/p,W/p,C,p,p) -> (M, C*p*p)
    # With use_input_fusion this producer is fused into the kernel's input DMA
    # (no patches2d materialization in HBM); otherwise XLA emits it as one
    # fused transpose+convert pass.
    patches = x.reshape(B, C, H // p, p, W // p, p)
    patches = patches.transpose(0, 2, 4, 1, 3, 5)
    N = (H // p) * (W // p)
    M = B * N
    patches2d = patches.reshape(M, cpp).astype(jnp.bfloat16)

    w_t = weight.T.astype(jnp.bfloat16)                 # (cpp, n_embd)
    b2d = bias.reshape(1, n_embd).astype(jnp.float32)   # (1, n_embd)

    # ---- lane-dense padding (128); only when actually needed ----
    cpp_p = _round_up(cpp, 128)
    ne_p = _round_up(n_embd, 128)
    if cpp_p != cpp:
        patches2d = jnp.pad(patches2d, ((0, 0), (0, cpp_p - cpp)))
        w_t = jnp.pad(w_t, ((0, cpp_p - cpp), (0, 0)))
    if ne_p != n_embd:
        w_t = jnp.pad(w_t, ((0, 0), (0, ne_p - n_embd)))
        b2d = jnp.pad(b2d, ((0, 0), (0, ne_p - n_embd)))

    # ---- VMEM-aware M tile; pad M only if the grid doesn't divide evenly ----
    out_bytes = jnp.dtype(out_dtype).itemsize
    tm, vmem_budget = _pick_tm(M, cpp_p, ne_p, out_bytes, tm_max)
    m_pad = _round_up(M, tm)
    if m_pad != M:
        patches2d = jnp.pad(patches2d, ((0, m_pad - M), (0, 0)))

    grid = (pl.cdiv(m_pad, tm),)

    params = dict(
        dimension_semantics=("parallel",),      # shards M tiles over 2 TCs on v7x
        vmem_limit_bytes=int(vmem_budget),
    )
    if use_input_fusion:
        # Fuse the patchify producer into the patches operand (input 0 only).
        params["allow_input_fusion"] = [True, False, False]

    out2d = pl.pallas_call(
        _proj_kernel,
        out_shape=jax.ShapeDtypeStruct((m_pad, ne_p), out_dtype),
        grid=grid,
        in_specs=[
            pl.BlockSpec((tm, cpp_p), lambda i: (i, 0)),    # patches tile
            pl.BlockSpec((cpp_p, ne_p), lambda i: (0, 0)),  # weight: VMEM-resident
            pl.BlockSpec((1, ne_p), lambda i: (0, 0)),      # bias: VMEM-resident
        ],
        out_specs=pl.BlockSpec((tm, ne_p), lambda i: (i, 0)),
        compiler_params=pltpu.CompilerParams(**params),
    )(patches2d, w_t, b2d)

    # ---- trim padding only when it exists (skips an extra HBM pass when
    #      M and n_embd are already aligned) ----
    if m_pad != M or ne_p != n_embd:
        out2d = out2d[:M, :n_embd]
    return out2d.reshape(B, N, n_embd)


if __name__ == "__main__":
    # config: n_channels=4, patch_size=4, n_embd=32 ; input 2x4x16x16
    B, C, H, W = 2, 4, 16, 16
    patch_size = 4
    n_embd = 32
    cpp = C * patch_size * patch_size

    key = jax.random.PRNGKey(0)
    kx, kw, kb = jax.random.split(key, 3)
    x = jax.random.normal(kx, (B, C, H, W), dtype=jnp.float32)
    # deterministic Linear params (same shapes as nn.Linear(cpp, n_embd))
    weight = jax.random.normal(kw, (n_embd, cpp), dtype=jnp.float32) * (1.0 / cpp ** 0.5)
    bias = jax.random.normal(kb, (n_embd,), dtype=jnp.float32) * 0.01

    def run(use_fusion):
        fn = jax.jit(functools.partial(
            patch_embedding, patch_size=patch_size, use_input_fusion=use_fusion))
        return jax.block_until_ready(fn(x, weight, bias))

    try:
        out = run(True)
    except Exception:
        # Toolchain rejected allow_input_fusion: fall back to the plain path.
        out = run(False)

    # pure-JAX reference with the same bf16-operand / f32-accumulate recipe
    patches_ref = x.reshape(B, C, H // patch_size, patch_size,
                            W // patch_size, patch_size)
    patches_ref = patches_ref.transpose(0, 2, 4, 1, 3, 5).reshape(B, -1, cpp)
    ref = jnp.dot(patches_ref.astype(jnp.bfloat16),
                  weight.T.astype(jnp.bfloat16),
                  preferred_element_type=jnp.float32) + bias

    N = (H // patch_size) * (W // patch_size)
    assert out.shape == (B, N, n_embd)
    assert out.dtype == jnp.bfloat16
    assert jnp.allclose(out.astype(jnp.float32), ref, atol=3e-2, rtol=3e-2)

    print("KERNEL_OK")
</pallas_src>

<mosaic_0001>
module attributes {stable_mosaic.version = 11 : i64} {
  func.func @_proj_kernel(%arg0: i32, %arg1: memref<32x128xbf16, #tpu.memory_space<vmem>>, %arg2: memref<128x128xbf16, #tpu.memory_space<vmem>>, %arg3: memref<1x128xf32, #tpu.memory_space<vmem>>, %arg4: memref<32x128xbf16, #tpu.memory_space<vmem>>) attributes {dimension_semantics = [#tpu.dimension_semantics<parallel>], iteration_bounds = array<i64: 1>, scalar_prefetch = 0 : i64, scratch_operands = 0 : i64, tpu.core_type = #tpu.core_type<tc>, window_params = [{transform_indices = @transform_0, window_bounds = array<i64: 32, 128>}, {pipeline_mode = #tpu.pipeline_mode<synchronous>, transform_indices = @transform_1, window_bounds = array<i64: 128, 128>}, {pipeline_mode = #tpu.pipeline_mode<synchronous>, transform_indices = @transform_2, window_bounds = array<i64: 1, 128>}, {transform_indices = @transform_3, window_bounds = array<i64: 32, 128>}]} {
    %c0 = arith.constant 0 : index
    %c0_0 = arith.constant 0 : index
    %0 = vector.load %arg1[%c0, %c0_0] : memref<32x128xbf16, #tpu.memory_space<vmem>>, vector<32x128xbf16>
    %c0_1 = arith.constant 0 : index
    %c0_2 = arith.constant 0 : index
    %1 = vector.load %arg2[%c0_1, %c0_2] : memref<128x128xbf16, #tpu.memory_space<vmem>>, vector<128x128xbf16>
    %cst = arith.constant dense<0.000000e+00> : vector<32x128xf32>
    %2 = tpu.matmul %0, %1, %cst {dimension_numbers = #tpu.dot_dimension_numbers<[1], [0], [0], [1], [0, 0, 1, 1], [], []>} : vector<32x128xbf16>, vector<128x128xbf16>, vector<32x128xf32> -> vector<32x128xf32>
    %c0_3 = arith.constant 0 : index
    %c0_4 = arith.constant 0 : index
    %3 = vector.load %arg3[%c0_3, %c0_4] : memref<1x128xf32, #tpu.memory_space<vmem>>, vector<1x128xf32>
    %4 = vector.broadcast %3 : vector<1x128xf32> to vector<32x128xf32>
    %5 = arith.addf %2, %4 : vector<32x128xf32>
    %6 = arith.truncf %5 : vector<32x128xf32> to vector<32x128xbf16>
    %c0_5 = arith.constant 0 : index
    %c0_6 = arith.constant 0 : index
    %7 = vector.load %arg4[%c0_5, %c0_6] : memref<32x128xbf16, #tpu.memory_space<vmem>>, vector<32x128xbf16>
    tpu.vector_store %arg4[%c0_5, %c0_6], %6 {strides = array<i32>} : memref<32x128xbf16, #tpu.memory_space<vmem>>, vector<32x128xbf16>,
    return
  }
  func.func @transform_0(%arg0: i32) -> (i32, i32) {
    %c0_i32 = arith.constant 0 : i32
    %c0_i32_0 = arith.constant 0 : i32
    return %arg0, %c0_i32 : i32, i32
  }
  func.func @transform_1(%arg0: i32) -> (i32, i32) {
    %c0_i32 = arith.constant 0 : i32
    %c0_i32_0 = arith.constant 0 : i32
    %c0_i32_1 = arith.constant 0 : i32
    return %c0_i32, %c0_i32_0 : i32, i32
  }
  func.func @transform_2(%arg0: i32) -> (i32, i32) {
    %c0_i32 = arith.constant 0 : i32
    %c0_i32_0 = arith.constant 0 : i32
    %c0_i32_1 = arith.constant 0 : i32
    return %c0_i32, %c0_i32_0 : i32, i32
  }
  func.func @transform_3(%arg0: i32) -> (i32, i32) {
    %c0_i32 = arith.constant 0 : i32
    %c0_i32_0 = arith.constant 0 : i32
    return %arg0, %c0_i32 : i32, i32
  }
}

module attributes {stable_mosaic.version = 11 : i64} {
  func.func @_proj_kernel(%arg0: i32, %arg1: memref<32x128xbf16, #tpu.memory_space<vmem>>, %arg2: memref<128x128xbf16, #tpu.memory_space<vmem>>, %arg3: memref<1x128xf32, #tpu.memory_space<vmem>>, %arg4: memref<32x128xbf16, #tpu.memory_space<vmem>>) attributes {dimension_semantics = [#tpu.dimension_semantics<parallel>], iteration_bounds = array<i64: 1>, scalar_prefetch = 0 : i64, scratch_operands = 0 : i64, tpu.core_type = #tpu.core_type<tc>, window_params = [{transform_indices = @transform_0, window_bounds = array<i64: 32, 128>}, {pipeline_mode = #tpu.pipeline_mode<synchronous>, transform_indices = @transform_1, window_bounds = array<i64: 128, 128>}, {pipeline_mode = #tpu.pipeline_mode<synchronous>, transform_indices = @transform_2, window_bounds = array<i64: 1, 128>}, {transform_indices = @transform_3, window_bounds = array<i64: 32, 128>}]} {
    %c0 = arith.constant 0 : index
    %c0_0 = arith.constant 0 : index
    %0 = vector.load %arg1[%c0, %c0_0] : memref<32x128xbf16, #tpu.memory_space<vmem>>, vector<32x128xbf16>
    %c0_1 = arith.constant 0 : index
    %c0_2 = arith.constant 0 : index
    %1 = vector.load %arg2[%c0_1, %c0_2] : memref<128x128xbf16, #tpu.memory_space<vmem>>, vector<128x128xbf16>
    %cst = arith.constant dense<0.000000e+00> : vector<32x128xf32>
    %2 = tpu.matmul %0, %1, %cst {dimension_numbers = #tpu.dot_dimension_numbers<[1], [0], [0], [1], [0, 0, 1, 1], [], []>} : vector<32x128xbf16>, vector<128x128xbf16>, vector<32x128xf32> -> vector<32x128xf32>
    %c0_3 = arith.constant 0 : index
    %c0_4 = arith.constant 0 : index
    %3 = vector.load %arg3[%c0_3, %c0_4] : memref<1x128xf32, #tpu.memory_space<vmem>>, vector<1x128xf32>
    %4 = vector.broadcast %3 : vector<1x128xf32> to vector<32x128xf32>
    %5 = arith.addf %2, %4 : vector<32x128xf32>
    %6 = arith.truncf %5 : vector<32x128xf32> to vector<32x128xbf16>
    %c0_5 = arith.constant 0 : index
    %c0_6 = arith.constant 0 : index
    %7 = vector.load %arg4[%c0_5, %c0_6] : memref<32x128xbf16, #tpu.memory_space<vmem>>, vector<32x128xbf16>
    tpu.vector_store %arg4[%c0_5, %c0_6], %6 {strides = array<i32>} : memref<32x128xbf16, #tpu.memory_space<vmem>>, vector<32x128xbf16>,
    return
  }
  func.func @transform_0(%arg0: i32) -> (i32, i32) {
    %c0_i32 = arith.constant 0 : i32
    %c0_i32_0 = arith.constant 0 : i32
    return %arg0, %c0_i32 : i32, i32
  }
  func.func @transform_1(%arg0: i32) -> (i32, i32) {
    %c0_i32 = arith.constant 0 : i32
    %c0_i32_0 = arith.constant 0 : i32
    %c0_i32_1 = arith.constant 0 : i32
    return %c0_i32, %c0_i32_0 : i32, i32
  }
  func.func @transform_2(%arg0: i32) -> (i32, i32) {
    %c0_i32 = arith.constant 0 : i32
    %c0_i32_0 = arith.constant 0 : i32
    %c0_i32_1 = arith.constant 0 : i32
    return %c0_i32, %c0_i32_0 : i32, i32
  }
  func.func @transform_3(%arg0: i32) -> (i32, i32) {
    %c0_i32 = arith.constant 0 : i32
    %c0_i32_0 = arith.constant 0 : i32
    return %arg0, %c0_i32 : i32, i32
  }
}

</mosaic_0001>

<bundles_post_ra>
// kernel: patch_embedding.2
= control target key start
LH: loop header
LB: loop body
LE: loop exit
PB: predicated region body
PF: predicated region fallthrough
CT: control target
= control target key end

     0   :  { %s458_s0 = inlined_call_operand.vmem [shape: bf16[128,128], index: 0, kind: input, shape index: {}]   ;;  %s459_s1 = inlined_call_operand.vmem [shape: f32[1,128], index: 1, kind: input, shape index: {}]   ;;  %s460_s2 = inlined_call_operand.vmem [shape: bf16[32,64], index: 2, kind: input, shape index: {}]   ;;  %s461_s3 = inlined_call_operand.<no memory space> [shape: bf16[], index: 3, kind: input, shape index: {}]   ;;  %s462_s4 = inlined_call_operand.hbm [shape: bf16[32,128], index: 4, kind: output, shape index: {}]  }
   0x1   :  { %v9_v0 = vstv %s461_s3 }
   0x2   :  { %v10_v1 = vunpack.i.l.bf16 %v9_v0 }
   0x3   :  { %v347_v2 = vld [vmem:[%s458_s0] sm:$0xff]   ;;  %v33_v3 = vlaneseq  ;;  %v348_v4 = vld [vmem:[%s458_s0 + $0x8] sm:$0xff]   ;;  %v349_v5 = vld [vmem:[%s458_s0 + $0x10] sm:$0xff]  }
   0x4   :  { %323 = vmatprep.subr.bf16.mxu0 %v347_v2  ;;  %v350_v7 = vld [vmem:[%s458_s0 + $0x18] sm:$0xff]   ;;  %v30_v8 = vld [vmem:[%s460_s2] sm:$0xff]   ;;  %v281_v9 = vld [vmem:[%s460_s2 + $0x8] sm:$0xff]  }
   0x5   :  { %324 = vmatpush3.bf16.msra.mxu0 %v347_v2  ;;  %v34_v6 = vand.u32 127, %v33_v3 }
   0x6   :  { %325 = vmatprep.subr.bf16.mxu0 %v348_v4 }
   0x7   :  { %vm36_vm0 = vcmp.lt.s32.totalorder %v34_v6, 64 }
   0x9   :  { %326 = vmatpush3.bf16.msra.mxu0 %v348_v4 }
   0xa   :  { %327 = vmatprep.subr.bf16.mxu0 %v349_v5 }
   0xb   :  { %14 = vsyncpa [#allocation8], 0  ;;  %v31_v10 = vunpack.c.l.bf16 %v30_v8  ;;  %v52_v11 = vunpack.c.h.bf16 %v30_v8  ;;  %v74_v12 = vunpack.c.l.bf16 %v281_v9  ;;  %v96_v13 = vunpack.c.h.bf16 %v281_v9  ;;  %v351_v18 = vld [vmem:[%s458_s0 + $0x20] sm:$0xff]   ;;  %v352_v24 = vld [vmem:[%s458_s0 + $0x28] sm:$0xff]   ;;  %s382_s11 = smov [#allocation7]  }
   0xc   :  { %v381_v19 = vmov 0.0   ;;  %v353_v25 = vld [vmem:[%s458_s0 + $0x30] sm:$0xff]   ;;  %v354_v27 = vld [vmem:[%s458_s0 + $0x38] sm:$0xff]   ;;  %v283_v30 = vld [vmem:[%s459_s1] ss:$0 sm:$0xff]  ;;  %s269_s12 = sshll.u32 %s382_s11, 4  ;;  %s270_s12 = int_to_ptr.vmem [resolvable:$true] %s269_s12 }
   0xd   :  { %328 = vmatpush3.bf16.msra.mxu0 %v349_v5  ;;  %v37_v14 = vsel %vm36_vm0, %v31_v10, %v10_v1  ;;  %v58_v15 = vsel %vm36_vm0, %v52_v11, %v10_v1  ;;  %v80_v16 = vsel %vm36_vm0, %v74_v12, %v10_v1  ;;  %v102_v17 = vsel %vm36_vm0, %v96_v13, %v10_v1  ;;  %s357_s0 = scalar_lea.vmem %s270_s12, 256  ;;  %p362_p1 = scmp.lt.s32.totalorder %s270_s12, %s270_s12 }
   0xe   :  { %329 = vmatprep.subr.bf16.mxu0 %v350_v7  ;;  %v38_v20 = vpack.c.bf16 %v381_v19, %v37_v14  ;;  %v60_v21 = vpack.c.bf16 %v381_v19, %v58_v15  ;;  %v82_v22 = vpack.c.bf16 %v381_v19, %v80_v16  ;;  %v104_v23 = vpack.c.bf16 %v381_v19, %v102_v17  ;;  %p358_p0 = scmp.ne.s32.totalorder %s270_s12, %s357_s0  ;;  %p363_p2 = scmp.lt.s32.totalorder %s357_s0, %s357_s0 }
  0x10   :  { %40 = vst [vmem:[#allocation9] sm:$0xf] %v38_v20  ;;  %62 = vst [vmem:[#allocation9 + $0x4] sm:$0xf] %v60_v21  ;;  %p364_p3 = por %p363_p2, %p362_p1 }
  0x11   :  { %84 = vst [vmem:[#allocation9 + $0x8] sm:$0xf] %v82_v22  ;;  %106 = vst [vmem:[#allocation9 + $0xc] sm:$0xf] %v104_v23  ;;  %330 = vmatpush3.bf16.msra.mxu0 %v350_v7 }
  0x12   :  { %331 = vmatprep.subr.bf16.mxu0 %v351_v18  ;;  %p365_p4 = pnand %p364_p3, %p358_p0 }
  0x15   :  { %332 = vmatpush3.bf16.msra.mxu0 %v351_v18 }
  0x16   :  { %333 = vmatprep.subr.bf16.mxu0 %v352_v24 }
  0x17   :  { %v355_v26 = vld [vmem:[#allocation9] sm:$0xff]  }
  0x18   :  { %339 = vmatprep.mubr.bf16.mxu0 %v355_v26  ;;  %v356_v28 = vld [vmem:[#allocation9 + $0x8] sm:$0xff]  }
  0x19   :  { %334 = vmatpush3.bf16.msra.mxu0 %v352_v24 }
  0x1a   :  { %335 = vmatprep.subr.bf16.mxu0 %v353_v25 }
  0x1d   :  { %336 = vmatpush3.bf16.msra.mxu0 %v353_v25 }
  0x1e   :  { %337 = vmatprep.subr.bf16.mxu0 %v354_v27 }
  0x21   :  { %338 = vmatpush3.bf16.msra.mxu0 %v354_v27 }
  0x24   :  { %340 = vmatmul.mubr.bf16.vlgmr.msra.gmra.mrb[0].mxu0 %v356_v28 }
  0xf7   :  { %v341_v29 = vpop.f32.mrb[0].mxu0 }
  0xf8   :  { %v229_v31 = vpop.f32.mrb[1].mxu0  ;;  %v238_v33 = vadd.f32 %v341_v29, %v283_v30 }
  0xf9   :  { %v342_v32 = vpop.f32.mrb[2].mxu0  ;;  %v230_v36 = vadd.f32 %v283_v30, %v229_v31 }
  0xfa   :  { %v241_v34 = vadd.f32 %v342_v32, %v283_v30  ;;  %v232_v35 = vpop.f32.mrb[3].mxu0 }
  0xfb   :  { %v233_v37 = vadd.f32 %v283_v30, %v232_v35 }
  0xfc   :  { %v310_v38 = vpack.c.bf16 %v241_v34, %v238_v33 }
  0xfd   :  { %v305_v39 = vpack.c.bf16 %v233_v37, %v230_v36 }
  0xfe   :  { %312 = vst [vmem:[#allocation7 + $0x8] sm:$0xff] %v310_v38  }
  0xff   :  { %306 = vst [vmem:[#allocation7] sm:$0xff] %v305_v39  }
 0x100   :  { %368 = shalt.err (!%p365_p4)
}
 0x101   :  { %s369_s14 = scalar_lea.hbm %s462_s4, 256 }
 0x102   :  { %p370_p5 = scmp.ne.s32.totalorder %s462_s4, %s369_s14  ;;  %p373_p6 = scmp.lt.u32.totalorder %s369_s14, %s462_s4 }
 0x104   :  { %p375_p7 = pnand %p373_p6, %p370_p5 }
 0x106   :  { %378 = shalt.err (!%p375_p7)
}
 0x107   :  { %s383_s19 = smov 64   ;;  %s384_s20 = smov 4  }
 0x108   :  { %275 = dma.vmem_to_hbm [thread:$0]  %s270_s12, 256, %s462_s4, [#allocation8], %s383_s19, %s383_s19, %s384_s20  }
 0x109   :  { %379 = dma.done.wait [#allocation8], 256  }
 0x10a   :  { %380 = vsyncadd [#allocation8], 4294967040 }
 0x10b   :  { %279 = vsyncpa [#allocation8], 1 }

// kernel: patch_embedding.1
= control target key start
LH: loop header
LB: loop body
LE: loop exit
PB: predicated region body
PF: predicated region fallthrough
CT: control target
= control target key end

     0   :  { %s353_s0 = inlined_call_operand.vmem [shape: bf16[32,128], index: 0, kind: input, shape index: {}]   ;;  %s354_s1 = inlined_call_operand.vmem [shape: bf16[128,128], index: 1, kind: input, shape index: {}]   ;;  %s355_s2 = inlined_call_operand.vmem [shape: f32[1,128], index: 2, kind: input, shape index: {}]   ;;  %s356_s3 = inlined_call_operand.hbm [shape: bf16[32,128], index: 3, kind: output, shape index: {}]  }
   0x1   :  { %v251_v0 = vld [vmem:[%s354_s1] sm:$0xff]   ;;  %v252_v1 = vld [vmem:[%s354_s1 + $0x8] sm:$0xff]   ;;  %v253_v2 = vld [vmem:[%s354_s1 + $0x10] sm:$0xff]  }
   0x2   :  { %228 = vmatprep.subr.bf16.mxu0 %v251_v0  ;;  %v254_v3 = vld [vmem:[%s354_s1 + $0x18] sm:$0xff]   ;;  %v259_v4 = vld [vmem:[%s353_s0] sm:$0xff]  }
   0x3   :  { %229 = vmatpush3.bf16.msra.mxu0 %v251_v0  ;;  %244 = vmatprep.mubr.bf16.mxu0 %v259_v4 }
   0x4   :  { %230 = vmatprep.subr.bf16.mxu0 %v252_v1 }
   0x7   :  { %231 = vmatpush3.bf16.msra.mxu0 %v252_v1 }
   0x8   :  { %232 = vmatprep.subr.bf16.mxu0 %v253_v2 }
   0x9   :  { %8 = vsyncpa [#allocation3], 0  ;;  %v255_v5 = vld [vmem:[%s354_s1 + $0x20] sm:$0xff]   ;;  %v256_v6 = vld [vmem:[%s354_s1 + $0x28] sm:$0xff]   ;;  %s285_s7 = smov [#allocation2]  }
   0xa   :  { %v257_v7 = vld [vmem:[%s354_s1 + $0x30] sm:$0xff]   ;;  %v258_v8 = vld [vmem:[%s354_s1 + $0x38] sm:$0xff]   ;;  %v260_v9 = vld [vmem:[%s353_s0 + $0x8] sm:$0xff]   ;;  %s177_s8 = sshll.u32 %s285_s7, 4  ;;  %s178_s8 = int_to_ptr.vmem [resolvable:$true] %s177_s8 }
   0xb   :  { %233 = vmatpush3.bf16.msra.mxu0 %v253_v2  ;;  %v188_v11 = vld [vmem:[%s355_s2] ss:$0 sm:$0xff]  ;;  %s261_s0 = scalar_lea.vmem %s178_s8, 256  ;;  %p266_p1 = scmp.lt.s32.totalorder %s178_s8, %s178_s8 }
   0xc   :  { %234 = vmatprep.subr.bf16.mxu0 %v254_v3  ;;  %p262_p0 = scmp.ne.s32.totalorder %s178_s8, %s261_s0  ;;  %p267_p2 = scmp.lt.s32.totalorder %s261_s0, %s261_s0 }
   0xe   :  { %p268_p3 = por %p267_p2, %p266_p1 }
   0xf   :  { %235 = vmatpush3.bf16.msra.mxu0 %v254_v3 }
  0x10   :  { %236 = vmatprep.subr.bf16.mxu0 %v255_v5  ;;  %p269_p4 = pnand %p268_p3, %p262_p0 }
  0x13   :  { %237 = vmatpush3.bf16.msra.mxu0 %v255_v5 }
  0x14   :  { %238 = vmatprep.subr.bf16.mxu0 %v256_v6 }
  0x17   :  { %239 = vmatpush3.bf16.msra.mxu0 %v256_v6 }
  0x18   :  { %240 = vmatprep.subr.bf16.mxu0 %v257_v7 }
  0x1b   :  { %241 = vmatpush3.bf16.msra.mxu0 %v257_v7 }
  0x1c   :  { %242 = vmatprep.subr.bf16.mxu0 %v258_v8 }
  0x1f   :  { %243 = vmatpush3.bf16.msra.mxu0 %v258_v8 }
  0x22   :  { %245 = vmatmul.mubr.bf16.vlgmr.msra.gmra.mrb[0].mxu0 %v260_v9 }
  0xf5   :  { %v246_v10 = vpop.f32.mrb[0].mxu0 }
  0xf6   :  { %v137_v12 = vpop.f32.mrb[1].mxu0  ;;  %v146_v14 = vadd.f32 %v246_v10, %v188_v11 }
  0xf7   :  { %v247_v13 = vpop.f32.mrb[2].mxu0  ;;  %v138_v17 = vadd.f32 %v188_v11, %v137_v12 }
  0xf8   :  { %v149_v15 = vadd.f32 %v247_v13, %v188_v11  ;;  %v140_v16 = vpop.f32.mrb[3].mxu0 }
  0xf9   :  { %v141_v18 = vadd.f32 %v188_v11, %v140_v16 }
  0xfa   :  { %v215_v19 = vpack.c.bf16 %v149_v15, %v146_v14 }
  0xfb   :  { %v210_v20 = vpack.c.bf16 %v141_v18, %v138_v17 }
  0xfc   :  { %217 = vst [vmem:[#allocation2 + $0x8] sm:$0xff] %v215_v19  }
  0xfd   :  { %211 = vst [vmem:[#allocation2] sm:$0xff] %v210_v20  }
  0xfe   :  { %272 = shalt.err (!%p269_p4)
}
  0xff   :  { %s273_s9 = scalar_lea.hbm %s356_s3, 256 }
 0x100   :  { %p274_p5 = scmp.ne.s32.totalorder %s356_s3, %s273_s9  ;;  %p277_p6 = scmp.lt.u32.totalorder %s273_s9, %s356_s3 }
 0x102   :  { %p279_p7 = pnand %p277_p6, %p274_p5 }
 0x104   :  { %282 = shalt.err (!%p279_p7)
}
 0x105   :  { %s286_s14 = smov 64   ;;  %s287_s15 = smov 4  }
 0x106   :  { %183 = dma.vmem_to_hbm [thread:$0]  %s178_s8, 256, %s356_s3, [#allocation3], %s286_s14, %s286_s14, %s287_s15  }
 0x107   :  { %283 = dma.done.wait [#allocation3], 256  }
 0x108   :  { %284 = vsyncadd [#allocation3], 4294967040 }
 0x109   :  { %187 = vsyncpa [#allocation3], 1 }

</bundles_post_ra>
